<compile_context>
chip_gen: v6e
topology: v6e:2x2x1
jax: 0.10.0
libtpu: 0.0.40
codegen_flags: <defaults>
</compile_context>

<pallas_src>
import functools

import jax
import jax.numpy as jnp
from jax.experimental import pallas as pl
from jax.experimental.pallas import tpu as pltpu


def actor_kernel(x_ref, w1_ref, b1_ref, w2_ref, b2_ref, w3_ref, b3_ref,
                 out_ref):
    """One batch tile: 3 matmuls + biases + tanh + stable softmax, fused."""
    n_actions = w3_ref.shape[1]

    x = x_ref[...]

    # h1 = tanh(x @ W1 + b1)   (bias add rides free in a VPU slot under MXU)
    h1 = jnp.tanh(
        jnp.dot(x, w1_ref[...], preferred_element_type=jnp.float32)
        + b1_ref[...]
    )
    # h2 = tanh(h1 @ W2 + b2)
    h2 = jnp.tanh(
        jnp.dot(h1, w2_ref[...], preferred_element_type=jnp.float32)
        + b2_ref[...]
    )
    # logits = h2 @ W3 + b3
    logits = (
        jnp.dot(h2, w3_ref[...], preferred_element_type=jnp.float32)
        + b3_ref[...]
    )

    # Categorical(logits=...) normalization -> probabilities (stable softmax).
    m = jnp.max(logits, axis=-1, keepdims=True)
    e = jnp.exp(logits - m)
    probs = e * pl.reciprocal(jnp.sum(e, axis=-1, keepdims=True), approx=True)

    # Single fused output slab: [logits | probs] along lanes -> one output DMA.
    out_ref[:, :n_actions] = logits
    out_ref[:, n_actions:] = probs


@functools.partial(jax.jit, static_argnames=("tb",))
def actor_forward(x, w1_t, b1, w2_t, b2, w3_t, b3, *, tb=512):
    """x: (B, Din). w*_t are (in, out). Biases are (1, out).

    Returns (logits, probs), each (B, n_actions).
    """
    B, din = x.shape
    h1 = w1_t.shape[1]
    h2 = w2_t.shape[1]
    n_actions = w3_t.shape[1]

    # Batch tile: big enough to amortize per-step overhead, small enough to
    # stay well under v7x's 32 MiB scoped-VMEM default even with wide hiddens.
    TB = min(tb, B)
    grid = (pl.cdiv(B, TB),)

    fused = pl.pallas_call(
        actor_kernel,
        out_shape=jax.ShapeDtypeStruct((B, 2 * n_actions), jnp.float32),
        grid_spec=pltpu.PrefetchScalarGridSpec(
            num_scalar_prefetch=0,
            grid=grid,
            in_specs=[
                # x: tiled over batch
                pl.BlockSpec((TB, din), lambda i: (i, 0)),
                # weights / biases: constant block -> VMEM-resident across steps
                pl.BlockSpec((din, h1), lambda i: (0, 0)),
                pl.BlockSpec((1, h1), lambda i: (0, 0)),
                pl.BlockSpec((h1, h2), lambda i: (0, 0)),
                pl.BlockSpec((1, h2), lambda i: (0, 0)),
                pl.BlockSpec((h2, n_actions), lambda i: (0, 0)),
                pl.BlockSpec((1, n_actions), lambda i: (0, 0)),
            ],
            out_specs=pl.BlockSpec((TB, 2 * n_actions), lambda i: (i, 0)),
        ),
        compiler_params=pltpu.CompilerParams(
            # Batch tiles are independent -> shard across TCs on v7x.
            dimension_semantics=("parallel",),
        ),
    )(x, w1_t, b1, w2_t, b2, w3_t, b3)

    logits = fused[:, :n_actions]
    probs = fused[:, n_actions:]
    return logits, probs


def orthogonal_init(key, out_dim, in_dim, gain):
    """Deterministic orthogonal init (mirrors torch.nn.init.orthogonal_)."""
    rows, cols = max(out_dim, in_dim), min(out_dim, in_dim)
    a = jax.random.normal(key, (rows, cols), dtype=jnp.float32)
    q, r = jnp.linalg.qr(a)
    q = q * jnp.sign(jnp.diagonal(r))[None, :]
    if out_dim < in_dim:
        q = q.T
    return gain * q[:out_dim, :in_dim]


def make_actor_params(key, input_dim, h1_size, h2_size, n_actions):
    k1, k2, k3 = jax.random.split(key, 3)
    sqrt2 = jnp.sqrt(2.0).astype(jnp.float32)
    # torch Linear weight is (out, in); store transposed (in, out) for x @ W.
    w1_t = orthogonal_init(k1, h1_size, input_dim, sqrt2).T
    w2_t = orthogonal_init(k2, h2_size, h1_size, sqrt2).T
    w3_t = orthogonal_init(k3, n_actions, h2_size, 0.01).T
    b1 = jnp.zeros((1, h1_size), jnp.float32)
    b2 = jnp.zeros((1, h2_size), jnp.float32)
    b3 = jnp.zeros((1, n_actions), jnp.float32)
    return w1_t, b1, w2_t, b2, w3_t, b3


if __name__ == "__main__":
    # Module-default hidden sizes (256/256); batch of environment steps so the
    # batch grid actually takes >1 step (TB=128 -> 2 grid iterations). All
    # arrays are still tiny (<300 KiB).
    batch = 256
    input_dim = 16       # np.prod(input_dims)
    h1_size = 256
    h2_size = 256
    n_actions = 8

    key = jax.random.PRNGKey(0)
    kx, kp = jax.random.split(key)
    x = jax.random.normal(kx, (batch, input_dim), dtype=jnp.float32)
    params = make_actor_params(kp, input_dim, h1_size, h2_size, n_actions)

    logits, probs = actor_forward(x, *params, tb=128)
    jax.block_until_ready((logits, probs))

    # Pure-JAX reference check of the same forward pass.
    w1_t, b1, w2_t, b2, w3_t, b3 = params
    r1 = jnp.tanh(x @ w1_t + b1)
    r2 = jnp.tanh(r1 @ w2_t + b2)
    ref_logits = r2 @ w3_t + b3
    ref_probs = jax.nn.softmax(ref_logits, axis=-1)
    assert jnp.allclose(logits, ref_logits, atol=1e-5, rtol=1e-5)
    # probs use the EUP approx reciprocal -> ~1e-3 agreement.
    assert jnp.allclose(probs, ref_probs, atol=2e-3, rtol=2e-3)
    assert jnp.allclose(jnp.sum(probs, axis=-1), 1.0, atol=2e-3)

    # TODO(synk): in-kernel Gumbel-max sampling (pltpu.prng_*) could replace
    # the probs output entirely for the RL acting path.
    print("KERNEL_OK")
</pallas_src>

<mosaic_0001>
module attributes {stable_mosaic.version = 11 : i64} {
  func.func @actor_kernel(%arg0: i32, %arg1: memref<128x16xf32, #tpu.memory_space<vmem>>, %arg2: memref<16x256xf32, #tpu.memory_space<vmem>>, %arg3: memref<1x256xf32, #tpu.memory_space<vmem>>, %arg4: memref<256x256xf32, #tpu.memory_space<vmem>>, %arg5: memref<1x256xf32, #tpu.memory_space<vmem>>, %arg6: memref<256x8xf32, #tpu.memory_space<vmem>>, %arg7: memref<1x8xf32, #tpu.memory_space<vmem>>, %arg8: memref<128x16xf32, #tpu.memory_space<vmem>>) attributes {dimension_semantics = [#tpu.dimension_semantics<parallel>], iteration_bounds = array<i64: 2>, scalar_prefetch = 0 : i64, scratch_operands = 0 : i64, tpu.core_type = #tpu.core_type<tc>, window_params = [{transform_indices = @transform_0, window_bounds = array<i64: 128, 16>}, {pipeline_mode = #tpu.pipeline_mode<synchronous>, transform_indices = @transform_1, window_bounds = array<i64: 16, 256>}, {pipeline_mode = #tpu.pipeline_mode<synchronous>, transform_indices = @transform_2, window_bounds = array<i64: 1, 256>}, {pipeline_mode = #tpu.pipeline_mode<synchronous>, transform_indices = @transform_3, window_bounds = array<i64: 256, 256>}, {pipeline_mode = #tpu.pipeline_mode<synchronous>, transform_indices = @transform_4, window_bounds = array<i64: 1, 256>}, {pipeline_mode = #tpu.pipeline_mode<synchronous>, transform_indices = @transform_5, window_bounds = array<i64: 256, 8>}, {pipeline_mode = #tpu.pipeline_mode<synchronous>, transform_indices = @transform_6, window_bounds = array<i64: 1, 8>}, {transform_indices = @transform_7, window_bounds = array<i64: 128, 16>}]} {
    %c0 = arith.constant 0 : index
    %c0_0 = arith.constant 0 : index
    %0 = vector.load %arg1[%c0, %c0_0] : memref<128x16xf32, #tpu.memory_space<vmem>>, vector<128x16xf32>
    %c0_1 = arith.constant 0 : index
    %c0_2 = arith.constant 0 : index
    %1 = vector.load %arg2[%c0_1, %c0_2] : memref<16x256xf32, #tpu.memory_space<vmem>>, vector<16x256xf32>
    %cst = arith.constant dense<0.000000e+00> : vector<128x256xf32>
    %2 = tpu.matmul %0, %1, %cst {dimension_numbers = #tpu.dot_dimension_numbers<[1], [0], [0], [1], [0, 0, 1, 1], [], []>} : vector<128x16xf32>, vector<16x256xf32>, vector<128x256xf32> -> vector<128x256xf32>
    %c0_3 = arith.constant 0 : index
    %c0_4 = arith.constant 0 : index
    %3 = vector.load %arg3[%c0_3, %c0_4] : memref<1x256xf32, #tpu.memory_space<vmem>>, vector<1x256xf32>
    %4 = vector.broadcast %3 : vector<1x256xf32> to vector<128x256xf32>
    %5 = arith.addf %2, %4 : vector<128x256xf32>
    %6 = math.tanh %5 : vector<128x256xf32>
    %c0_5 = arith.constant 0 : index
    %c0_6 = arith.constant 0 : index
    %7 = vector.load %arg4[%c0_5, %c0_6] : memref<256x256xf32, #tpu.memory_space<vmem>>, vector<256x256xf32>
    %cst_7 = arith.constant dense<0.000000e+00> : vector<128x256xf32>
    %8 = tpu.matmul %6, %7, %cst_7 {dimension_numbers = #tpu.dot_dimension_numbers<[1], [0], [0], [1], [0, 0, 1, 1], [], []>} : vector<128x256xf32>, vector<256x256xf32>, vector<128x256xf32> -> vector<128x256xf32>
    %c0_8 = arith.constant 0 : index
    %c0_9 = arith.constant 0 : index
    %9 = vector.load %arg5[%c0_8, %c0_9] : memref<1x256xf32, #tpu.memory_space<vmem>>, vector<1x256xf32>
    %10 = vector.broadcast %9 : vector<1x256xf32> to vector<128x256xf32>
    %11 = arith.addf %8, %10 : vector<128x256xf32>
    %12 = math.tanh %11 : vector<128x256xf32>
    %c0_10 = arith.constant 0 : index
    %c0_11 = arith.constant 0 : index
    %13 = vector.load %arg6[%c0_10, %c0_11] : memref<256x8xf32, #tpu.memory_space<vmem>>, vector<256x8xf32>
    %cst_12 = arith.constant dense<0.000000e+00> : vector<128x8xf32>
    %14 = tpu.matmul %12, %13, %cst_12 {dimension_numbers = #tpu.dot_dimension_numbers<[1], [0], [0], [1], [0, 0, 1, 1], [], []>} : vector<128x256xf32>, vector<256x8xf32>, vector<128x8xf32> -> vector<128x8xf32>
    %c0_13 = arith.constant 0 : index
    %c0_14 = arith.constant 0 : index
    %15 = vector.load %arg7[%c0_13, %c0_14] : memref<1x8xf32, #tpu.memory_space<vmem>>, vector<1x8xf32>
    %16 = vector.broadcast %15 : vector<1x8xf32> to vector<128x8xf32>
    %17 = arith.addf %14, %16 : vector<128x8xf32>
    %cst_15 = arith.constant dense<0xFF800000> : vector<128xf32>
    %18 = vector.multi_reduction <maximumf>, %17, %cst_15 [1] : vector<128x8xf32> to vector<128xf32>
    %19 = vector.shape_cast %18 : vector<128xf32> to vector<128x1xf32>
    %20 = vector.broadcast %19 : vector<128x1xf32> to vector<128x8xf32>
    %21 = arith.subf %17, %20 : vector<128x8xf32>
    %22 = math.exp %21 : vector<128x8xf32>
    %cst_16 = arith.constant dense<0.000000e+00> : vector<128xf32>
    %23 = vector.multi_reduction <add>, %22, %cst_16 [1] : vector<128x8xf32> to vector<128xf32>
    %24 = vector.shape_cast %23 : vector<128xf32> to vector<128x1xf32>
    %25 = tpu.reciprocal %24 {approx = true} : vector<128x1xf32> -> vector<128x1xf32>
    %26 = vector.broadcast %25 : vector<128x1xf32> to vector<128x8xf32>
    %27 = arith.mulf %22, %26 : vector<128x8xf32>
    %c0_17 = arith.constant 0 : index
    %c0_18 = arith.constant 0 : index
    %28 = vector.load %arg8[%c0_17, %c0_18] : memref<128x16xf32, #tpu.memory_space<vmem>>, vector<128x8xf32>
    tpu.vector_store %arg8[%c0_17, %c0_18], %17 {strides = array<i32>} : memref<128x16xf32, #tpu.memory_space<vmem>>, vector<128x8xf32>,
    %c0_19 = arith.constant 0 : index
    %c8 = arith.constant 8 : index
    %29 = vector.load %arg8[%c0_19, %c8] : memref<128x16xf32, #tpu.memory_space<vmem>>, vector<128x8xf32>
    tpu.vector_store %arg8[%c0_19, %c8], %27 {strides = array<i32>} : memref<128x16xf32, #tpu.memory_space<vmem>>, vector<128x8xf32>,
    return
  }
  func.func @transform_0(%arg0: i32) -> (i32, i32) {
    %c0_i32 = arith.constant 0 : i32
    %c0_i32_0 = arith.constant 0 : i32
    return %arg0, %c0_i32 : i32, i32
  }
  func.func @transform_1(%arg0: i32) -> (i32, i32) {
    %c0_i32 = arith.constant 0 : i32
    %c0_i32_0 = arith.constant 0 : i32
    %c0_i32_1 = arith.constant 0 : i32
    return %c0_i32, %c0_i32_0 : i32, i32
  }
  func.func @transform_2(%arg0: i32) -> (i32, i32) {
    %c0_i32 = arith.constant 0 : i32
    %c0_i32_0 = arith.constant 0 : i32
    %c0_i32_1 = arith.constant 0 : i32
    return %c0_i32, %c0_i32_0 : i32, i32
  }
  func.func @transform_3(%arg0: i32) -> (i32, i32) {
    %c0_i32 = arith.constant 0 : i32
    %c0_i32_0 = arith.constant 0 : i32
    %c0_i32_1 = arith.constant 0 : i32
    return %c0_i32, %c0_i32_0 : i32, i32
  }
  func.func @transform_4(%arg0: i32) -> (i32, i32) {
    %c0_i32 = arith.constant 0 : i32
    %c0_i32_0 = arith.constant 0 : i32
    %c0_i32_1 = arith.constant 0 : i32
    return %c0_i32, %c0_i32_0 : i32, i32
  }
  func.func @transform_5(%arg0: i32) -> (i32, i32) {
    %c0_i32 = arith.constant 0 : i32
    %c0_i32_0 = arith.constant 0 : i32
    %c0_i32_1 = arith.constant 0 : i32
    return %c0_i32, %c0_i32_0 : i32, i32
  }
  func.func @transform_6(%arg0: i32) -> (i32, i32) {
    %c0_i32 = arith.constant 0 : i32
    %c0_i32_0 = arith.constant 0 : i32
    %c0_i32_1 = arith.constant 0 : i32
    return %c0_i32, %c0_i32_0 : i32, i32
  }
  func.func @transform_7(%arg0: i32) -> (i32, i32) {
    %c0_i32 = arith.constant 0 : i32
    %c0_i32_0 = arith.constant 0 : i32
    return %arg0, %c0_i32 : i32, i32
  }
}

</mosaic_0001>

<bundles_post_ra>
// kernel: actor_forward.1
= control target key start
LH: loop header
LB: loop body
LE: loop exit
PB: predicated region body
PF: predicated region fallthrough
CT: control target
= control target key end

     0   :  { %s1699_s24 = smov 0   ;;  %s2442_s0 = inlined_call_operand.vmem [shape: f32[256,16], index: 0, kind: input, shape index: {}]   ;;  %s2443_s1 = inlined_call_operand.vmem [shape: f32[16,256], index: 1, kind: input, shape index: {}]   ;;  %s2444_s2 = inlined_call_operand.vmem [shape: f32[1,256], index: 2, kind: input, shape index: {}]   ;;  %s2445_s3 = inlined_call_operand.vmem [shape: f32[256,256], index: 3, kind: input, shape index: {}]   ;;  %s2446_s4 = inlined_call_operand.vmem [shape: f32[1,256], index: 4, kind: input, shape index: {}]   ;;  %s2447_s5 = inlined_call_operand.vmem [shape: f32[256,8], index: 5, kind: input, shape index: {}]   ;;  %s2448_s6 = inlined_call_operand.vmem [shape: f32[1,8], index: 6, kind: input, shape index: {}]   ;;  %s2449_s7 = inlined_call_operand.vmem [shape: f32[256,16], index: 7, kind: output, shape index: {}]  }
   0x1 LB: > { %s1339_s25 = sadd.s32 4294967295, %s1655_s24   ;;  %p1343_p0 = scmp.ge.s32.totalorder %s1655_s24, 1  ;;  %s1655_s24 = sphi %s1699_s24, %s17_s24  }
   0x2   : > { %p238_p1 = scmp.lt.s32.totalorder %s1655_s24, 3 }
   0x4   : > { %p239_p2 = pnand %p1343_p0, %p238_p1 }
   0x5   : > { %s1344_s9 = sshll.u32 (!%p239_p2), %s1339_s25, 4 }
   0x6   : > { %242 = sbr.rel (%p239_p2) target bundleno = 1127 (0x467), region = 48  ;;  %p271_p3 = scmp.lt.s32.totalorder (!%p239_p2), %s1344_s9, 31 }
   0xb   : > { %v301_v0 = vld [vmem:[%s2443_s1 + $0x18] sm:$0xff]  ;;  %v300_v1 = vld [vmem:[%s2443_s1 + $0x10] sm:$0xff]  ;;  %v299_v2 = vld [vmem:[%s2443_s1 + $0x8] sm:$0xff]  ;;  %v1657_v4 = vmov 0.0   ;;  %s2451_s9 = smov (!%p271_p3, %s1344_s9), 31  ;;  %vm314_vm0 = vcmask 130048  }
   0xc   : > { %391 = vmatprep.subr.mxu0 %v301_v0  ;;  %v298_v3 = vld [vmem:[%s2443_s1] sm:$0xff]  ;;  %427 = vmatprep.mubr.f32.mxu0 %v1657_v4  ;;  %v587_v5 = vld [vmem:[%s2445_s3 + $0xf8] sm:$0xff]  ;;  %v586_v6 = vld [vmem:[%s2445_s3 + $0xf0] sm:$0xff]  ;;  %s1345_s25 = sshll.u32 %s2451_s9, 3  ;;  %vm1009_vm1 = vcmask 64512   ;;  %s1658_s9 = smov 8  }
   0xd   : > { %392 = vmatpush1.msra.mxu0 %v300_v1  ;;  %632 = vmatprep.subr.mxu1 %v587_v5  ;;  %v585_v7 = vld [vmem:[%s2445_s3 + $0xe8] sm:$0xff]  ;;  %v584_v8 = vld [vmem:[%s2445_s3 + $0xe0] sm:$0xff]  ;;  %v583_v9 = vld [vmem:[%s2445_s3 + $0xd8] sm:$0xff]  ;;  %s1749_s30 = scalar_lea.vmem %s2442_s0, %s1345_s25  ;;  %s2165_s18 = scalar_lea.vmem %s2449_s7, %s1345_s25  ;;  %vm1266_vm2 = vcmask 130112  }
   0xe   : > { %393 = vmatprep.subr.mxu0 %v299_v2  ;;  %633 = vmatpush1.msra.mxu1 %v586_v6  ;;  %v582_v10 = vld [vmem:[%s2445_s3 + $0xd0] sm:$0xff]  ;;  %v581_v11 = vld [vmem:[%s2445_s3 + $0xc8] sm:$0xff]  ;;  %v580_v12 = vld [vmem:[%s2445_s3 + $0xc0] sm:$0xff] }
   0xf   : > { %394 = vmatpush1.msra.mxu0 %v298_v3  ;;  %634 = vmatprep.subr.mxu1 %v585_v7  ;;  %v282_v13 = vld [vmem:[%s1749_s30] sm:$0xff]  ;;  %v579_v14 = vld [vmem:[%s2445_s3 + $0xb8] sm:$0xff]  ;;  %v578_v15 = vld [vmem:[%s2445_s3 + $0xb0] sm:$0xff] }
  0x10   : > { %635 = vmatpush1.msra.mxu1 %v584_v8  ;;  %1348 = vmatmul.mubr.msk.f32.vlgmr.msra.gmra.mxu0 %vm314_vm0, %v282_v13  ;;  %v283_v16 = vld [vmem:[%s1749_s30 + $0x8] sm:$0xff]  ;;  %v576_v18 = vld [vmem:[%s2445_s3 + $0xa0] sm:$0xff]  ;;  %v575_v19 = vld [vmem:[%s2445_s3 + $0x98] sm:$0xff] }
  0x11   : > { %636 = vmatprep.subr.mxu1 %v583_v9  ;;  %433 = vmatprep.mubr.f32.mxu0 %v1657_v4  ;;  %v577_v17 = vld [vmem:[%s2445_s3 + $0xa8] sm:$0xff]  ;;  %v574_v20 = vld [vmem:[%s2445_s3 + $0x90] sm:$0xff]  ;;  %v572_v23 = vld [vmem:[%s2445_s3 + $0x80] sm:$0xff] }
  0x12   : > { %637 = vmatpush1.msra.mxu1 %v582_v10  ;;  %v284_v21 = vld [vmem:[%s1749_s30 + $0x10] sm:$0xff]  ;;  %v573_v22 = vld [vmem:[%s2445_s3 + $0x88] sm:$0xff]  ;;  %v571_v24 = vld [vmem:[%s2445_s3 + $0x78] sm:$0xff] }
  0x13   : > { %638 = vmatprep.subr.mxu1 %v581_v11  ;;  %v570_v25 = vld [vmem:[%s2445_s3 + $0x70] sm:$0xff]  ;;  %v285_v26 = vld [vmem:[%s1749_s30 + $0x18] sm:$0xff]  ;;  %v569_v27 = vld [vmem:[%s2445_s3 + $0x68] sm:$0xff] }
  0x14   : > { %639 = vmatpush1.msra.mxu1 %v580_v12  ;;  %1349 = vmatmul.mubr.msk.f32.gmra.mxu0 %vm314_vm0, %v283_v16  ;;  %v568_v28 = vld [vmem:[%s2445_s3 + $0x60] sm:$0xff]  ;;  %v567_v29 = vld [vmem:[%s2445_s3 + $0x58] sm:$0xff]  ;;  %v566_v30 = vld [vmem:[%s2445_s3 + $0x50] sm:$0xff] }
  0x15   : > { %640 = vmatprep.subr.mxu1 %v579_v14  ;;  %439 = vmatprep.mubr.f32.mxu0 %v1657_v4  ;;  %v286_v31 = vld [vmem:[%s1749_s30 + $0x20] sm:$0xff]  ;;  %v565_v32 = vld [vmem:[%s2445_s3 + $0x48] sm:$0xff]  ;;  %v563_v34 = vld [vmem:[%s2445_s3 + $0x38] sm:$0xff] }
  0x16   : > { %641 = vmatpush1.msra.mxu1 %v578_v15  ;;  %v564_v33 = vld [vmem:[%s2445_s3 + $0x40] sm:$0xff]  ;;  %v562_v35 = vld [vmem:[%s2445_s3 + $0x30] sm:$0xff]  ;;  %v287_v36 = vld [vmem:[%s1749_s30 + $0x28] sm:$0xff] }
  0x17   : > { %642 = vmatprep.subr.mxu1 %v577_v17  ;;  %v561_v37 = vld [vmem:[%s2445_s3 + $0x28] sm:$0xff]  ;;  %v560_v38 = vld [vmem:[%s2445_s3 + $0x20] sm:$0xff]  ;;  %v559_v39 = vld [vmem:[%s2445_s3 + $0x18] sm:$0xff] }
  0x18   : > { %643 = vmatpush1.msra.mxu1 %v576_v18  ;;  %1350 = vmatmul.mubr.msk.f32.gmra.mxu0 %vm314_vm0, %v284_v21  ;;  %v558_v40 = vld [vmem:[%s2445_s3 + $0x10] sm:$0xff]  ;;  %v557_v42 = vld [vmem:[%s2445_s3 + $0x8] sm:$0xff]  ;;  %v556_v43 = vld [vmem:[%s2445_s3] sm:$0xff] }
  0x19   : > { %644 = vmatprep.subr.mxu1 %v575_v19  ;;  %445 = vmatprep.mubr.f32.mxu0 %v1657_v4  ;;  %v288_v41 = vld [vmem:[%s1749_s30 + $0x30] sm:$0xff]  ;;  %v619_v44 = vld [vmem:[%s2445_s3 + $0x1f8] sm:$0xff]  ;;  %v617_v47 = vld [vmem:[%s2445_s3 + $0x1e8] sm:$0xff] }
  0x1a   : > { %645 = vmatpush1.msra.mxu1 %v574_v20  ;;  %v618_v45 = vld [vmem:[%s2445_s3 + $0x1f0] sm:$0xff]  ;;  %v289_v46 = vld [vmem:[%s1749_s30 + $0x38] sm:$0xff]  ;;  %v616_v48 = vld [vmem:[%s2445_s3 + $0x1e0] sm:$0xff] }
  0x1b   : > { %646 = vmatprep.subr.mxu1 %v573_v22  ;;  %v615_v49 = vld [vmem:[%s2445_s3 + $0x1d8] sm:$0xff]  ;;  %v614_v50 = vld [vmem:[%s2445_s3 + $0x1d0] sm:$0xff]  ;;  %v290_v51 = vld [vmem:[%s1749_s30 + $0x40] sm:$0xff] }
  0x1c   : > { %647 = vmatpush1.msra.mxu1 %v572_v23  ;;  %1351 = vmatmul.mubr.msk.f32.gmra.mxu0 %vm314_vm0, %v285_v26  ;;  %v613_v52 = vld [vmem:[%s2445_s3 + $0x1c8] sm:$0xff]  ;;  %v612_v53 = vld [vmem:[%s2445_s3 + $0x1c0] sm:$0xff]  ;;  %v611_v54 = vld [vmem:[%s2445_s3 + $0x1b8] sm:$0xff] }
  0x1d   : > { %648 = vmatprep.subr.mxu1 %v571_v24  ;;  %451 = vmatprep.mubr.f32.mxu0 %v1657_v4  ;;  %v610_v55 = vld [vmem:[%s2445_s3 + $0x1b0] sm:$0xff]  ;;  %v291_v56 = vld [vmem:[%s1749_s30 + $0x48] sm:$0xff]  ;;  %v608_v58 = vld [vmem:[%s2445_s3 + $0x1a0] sm:$0xff] }
  0x1e   : > { %649 = vmatpush1.msra.mxu1 %v570_v25  ;;  %v609_v57 = vld [vmem:[%s2445_s3 + $0x1a8] sm:$0xff]  ;;  %v292_v59 = vld [vmem:[%s1749_s30 + $0x50] sm:$0xff]  ;;  %v293_v60 = vld [vmem:[%s1749_s30 + $0x58] sm:$0xff] }
  0x1f   : > { %650 = vmatprep.subr.mxu1 %v569_v27  ;;  %v294_v61 = vld [vmem:[%s1749_s30 + $0x60] sm:$0xff]  ;;  %v295_v62 = vld [vmem:[%s1749_s30 + $0x68] sm:$0xff]  ;;  %v296_v63 = vld [vmem:[%s1749_s30 + $0x70] sm:$0xff] }
  0x20   : > { %651 = vmatpush1.msra.mxu1 %v568_v28  ;;  %1352 = vmatmul.mubr.msk.f32.gmra.mxu0 %vm314_vm0, %v286_v31  ;;  %v297_v0 = vld [vmem:[%s1749_s30 + $0x78] sm:$0xff]  ;;  %v606_v2 = vld [vmem:[%s2445_s3 + $0x190] sm:$0xff]  ;;  %v605_v3 = vld [vmem:[%s2445_s3 + $0x188] sm:$0xff] }
  0x21   : > { %652 = vmatprep.subr.mxu1 %v567_v29  ;;  %457 = vmatprep.mubr.f32.mxu0 %v1657_v4  ;;  %v607_v1 = vld [vmem:[%s2445_s3 + $0x198] sm:$0xff]  ;;  %v602_v6 = vld [vmem:[%s2445_s3 + $0x170] sm:$0xff]  ;;  %v601_v7 = vld [vmem:[%s2445_s3 + $0x168] sm:$0xff] }
  0x22   : > { %653 = vmatpush1.msra.mxu1 %v566_v30  ;;  %v603_v5 = vld [vmem:[%s2445_s3 + $0x178] sm:$0xff]  ;;  %v600_v8 = vld [vmem:[%s2445_s3 + $0x160] sm:$0xff]  ;;  %v598_v10 = vld [vmem:[%s2445_s3 + $0x150] sm:$0xff] }
  0x23   : > { %654 = vmatprep.subr.mxu1 %v565_v32  ;;  %v599_v9 = vld [vmem:[%s2445_s3 + $0x158] sm:$0xff]  ;;  %v597_v11 = vld [vmem:[%s2445_s3 + $0x148] sm:$0xff]  ;;  %v596_v12 = vld [vmem:[%s2445_s3 + $0x140] sm:$0xff] }
  0x24   : > { %655 = vmatpush1.msra.mxu1 %v564_v33  ;;  %1353 = vmatmul.mubr.msk.f32.gmra.mxu0 %vm314_vm0, %v287_v36  ;;  %v595_v13 = vld [vmem:[%s2445_s3 + $0x138] sm:$0xff]  ;;  %v594_v14 = vld [vmem:[%s2445_s3 + $0x130] sm:$0xff]  ;;  %v593_v15 = vld [vmem:[%s2445_s3 + $0x128] sm:$0xff] }
  0x25   : > { %656 = vmatprep.subr.mxu1 %v563_v34  ;;  %463 = vmatprep.mubr.f32.mxu0 %v1657_v4  ;;  %v592_v16 = vld [vmem:[%s2445_s3 + $0x120] sm:$0xff]  ;;  %v591_v17 = vld [vmem:[%s2445_s3 + $0x118] sm:$0xff]  ;;  %v590_v18 = vld [vmem:[%s2445_s3 + $0x110] sm:$0xff] }
  0x26   : > { %657 = vmatpush1.msra.mxu1 %v562_v35  ;;  %v589_v19 = vld [vmem:[%s2445_s3 + $0x108] sm:$0xff]  ;;  %v588_v20 = vld [vmem:[%s2445_s3 + $0x100] sm:$0xff]  ;;  %v856_v21 = vld [vmem:[%s2447_s5 + $0xf8] sm:$0xff] }
  0x27   : > { %658 = vmatprep.subr.mxu1 %v561_v37  ;;  %v840_v22 = vld [vmem:[%s2447_s5 + $0x78] sm:$0xff]  ;;  %v855_v23 = vld [vmem:[%s2447_s5 + $0xf0] sm:$0xff]  ;;  %1367 = vmatprep.subr.mxu0 %v856_v21  ;;  %v854_v25 = vld [vmem:[%s2447_s5 + $0xe8] sm:$0xff] }
  0x28   : > { %659 = vmatpush1.msra.mxu1 %v560_v38  ;;  %1354 = vmatmul.mubr.msk.f32.gmra.mxu0 %vm314_vm0, %v288_v41  ;;  %v839_v24 = vld [vmem:[%s2447_s5 + $0x70] sm:$0xff]  ;;  %v838_v26 = vld [vmem:[%s2447_s5 + $0x68] sm:$0xff]  ;;  %v853_v27 = vld [vmem:[%s2447_s5 + $0xe0] sm:$0xff] }
  0x29   : > { %660 = vmatprep.subr.mxu1 %v559_v39  ;;  %469 = vmatprep.mubr.f32.mxu0 %v1657_v4  ;;  %v837_v28 = vld [vmem:[%s2447_s5 + $0x60] sm:$0xff]  ;;  %v852_v29 = vld [vmem:[%s2447_s5 + $0xd8] sm:$0xff]  ;;  %v851_v31 = vld [vmem:[%s2447_s5 + $0xd0] sm:$0xff] }
  0x2a   : > { %661 = vmatpush1.msra.mxu1 %v558_v40  ;;  %1368 = vmatpush3.msra.mxu0 %v840_v22  ;;  %v836_v30 = vld [vmem:[%s2447_s5 + $0x58] sm:$0xff]  ;;  %v835_v32 = vld [vmem:[%s2447_s5 + $0x50] sm:$0xff]  ;;  %v850_v33 = vld [vmem:[%s2447_s5 + $0xc8] sm:$0xff] }
  0x2b   : > { %662 = vmatprep.subr.mxu1 %v557_v42  ;;  %1369 = vmatprep.subr.mxu0 %v855_v23  ;;  %v834_v34 = vld [vmem:[%s2447_s5 + $0x48] sm:$0xff]  ;;  %v849_v35 = vld [vmem:[%s2447_s5 + $0xc0] sm:$0xff]  ;;  %v848_v37 = vld [vmem:[%s2447_s5 + $0xb8] sm:$0xff] }
  0x2c   : > { %663 = vmatpush1.msra.mxu1 %v556_v43  ;;  %1355 = vmatmul.mubr.msk.f32.gmra.mxu0 %vm314_vm0, %v289_v46  ;;  %v833_v36 = vld [vmem:[%s2447_s5 + $0x40] sm:$0xff]  ;;  %v832_v38 = vld [vmem:[%s2447_s5 + $0x38] sm:$0xff]  ;;  %v847_v39 = vld [vmem:[%s2447_s5 + $0xb0] sm:$0xff] }
  0x2d   : > { %664 = vmatprep.subr.mxu1 %v619_v44  ;;  %475 = vmatprep.mubr.f32.mxu0 %v1657_v4  ;;  %v831_v40 = vld [vmem:[%s2447_s5 + $0x30] sm:$0xff]  ;;  %v846_v41 = vld [vmem:[%s2447_s5 + $0xa8] sm:$0xff]  ;;  %v845_v43 = vld [vmem:[%s2447_s5 + $0xa0] sm:$0xff]  ;;  %v304_v44 = vlaneseq }
  0x2e   : > { %665 = vmatpush2.msra.mxu1 %v618_v45  ;;  %1370 = vmatpush3.msra.mxu0 %v839_v24  ;;  %v830_v42 = vld [vmem:[%s2447_s5 + $0x28] sm:$0xff] }
  0x2f   : > { %666 = vmatprep.subr.mxu1 %v617_v47  ;;  %1371 = vmatprep.subr.mxu0 %v854_v25  ;;  %v2038_v45 = vshrl.u32 %v304_v44, 7  ;;  %v302_v47 = vld [vmem:[%s2444_s2] sm:$0x3] }
  0x30   : > { %667 = vmatpush2.msra.mxu1 %v616_v48  ;;  %1356 = vmatmul.mubr.msk.f32.gmra.mxu0 %vm314_vm0, %v290_v51 }
  0x31   : > { %668 = vmatprep.subr.mxu1 %v615_v49  ;;  %481 = vmatprep.mubr.f32.mxu0 %v1657_v4  ;;  %v306_v46 = vsub.s32 0, %v2038_v45  ;;  %v310_v48 = vsub.s32 1, %v2038_v45 }
  0x32   : > { %669 = vmatpush2.msra.mxu1 %v614_v50  ;;  %1372 = vmatpush3.msra.mxu0 %v838_v26 }
  0x33   : > { %670 = vmatprep.subr.mxu1 %v613_v52  ;;  %1373 = vmatprep.subr.mxu0 %v853_v27  ;;  %v2047_v49 = vrot.slane %v302_v47, %v306_v46  ;;  %v2051_v50 = vrot.slane %v302_v47, %v310_v48 }
  0x34   : > { %671 = vmatpush2.msra.mxu1 %v612_v53  ;;  %1357 = vmatmul.mubr.msk.f32.gmra.mxu0 %vm314_vm0, %v291_v56 }
  0x35   : > { %672 = vmatprep.subr.mxu1 %v611_v54  ;;  %487 = vmatprep.mubr.f32.mxu0 %v1657_v4 }
  0x36   : > { %673 = vmatpush2.msra.mxu1 %v610_v55  ;;  %1374 = vmatpush3.msra.mxu0 %v837_v28 }
  0x37   : > { %674 = vmatprep.subr.mxu1 %v609_v57  ;;  %1375 = vmatprep.subr.mxu0 %v852_v29 }
  0x38   : > { %675 = vmatpush2.msra.mxu1 %v608_v58  ;;  %1358 = vmatmul.mubr.msk.f32.gmra.mxu0 %vm314_vm0, %v292_v59 }
  0x39   : > { %493 = vmatprep.mubr.f32.mxu0 %v1657_v4  ;;  %676 = vmatprep.subr.mxu1 %v607_v1 }
  0x3a   : > { %677 = vmatpush2.msra.mxu1 %v606_v2  ;;  %1376 = vmatpush3.msra.mxu0 %v836_v30 }
  0x3b   : > { %678 = vmatprep.subr.mxu1 %v605_v3  ;;  %1377 = vmatprep.subr.mxu0 %v851_v31 }
  0x3c   : > { %1359 = vmatmul.mubr.msk.f32.gmra.mxu0 %vm314_vm0, %v293_v60 }
  0x3d   : > { %499 = vmatprep.mubr.f32.mxu0 %v1657_v4  ;;  %1378 = vmatpush3.msra.mxu0 %v835_v32 }
  0x3e   : > { %1379 = vmatprep.subr.mxu0 %v850_v33 }
  0x3f   : > { %1380 = vmatpush3.msra.mxu0 %v834_v34 }
  0x40   : > { %1360 = vmatmul.mubr.msk.f32.gmra.mxu0 %vm314_vm0, %v294_v61  ;;  %1381 = vmatprep.subr.mxu0 %v849_v35 }
  0x41   : > { %505 = vmatprep.mubr.f32.mxu0 %v1657_v4  ;;  %1382 = vmatpush3.msra.mxu0 %v833_v36 }
  0x42   : > { %1383 = vmatprep.subr.mxu0 %v848_v37 }
  0x43   : > { %1384 = vmatpush3.msra.mxu0 %v832_v38 }
  0x44   : > { %1361 = vmatmul.mubr.msk.f32.gmra.mxu0 %vm314_vm0, %v295_v62  ;;  %1385 = vmatprep.subr.mxu0 %v847_v39 }
  0x45   : > { %511 = vmatprep.mubr.f32.mxu0 %v1657_v4  ;;  %1386 = vmatpush3.msra.mxu0 %v831_v40 }
  0x46   : > { %1387 = vmatprep.subr.mxu0 %v846_v41 }
  0x47   : > { %1388 = vmatpush3.msra.mxu0 %v830_v42 }
  0x48   : > { %1362 = vmatmul.mubr.msk.f32.gmra.mxu0 %vm314_vm0, %v296_v63  ;;  %1389 = vmatprep.subr.mxu0 %v845_v43 }
  0x49   : > { %517 = vmatprep.mubr.f32.mxu0 %v1657_v4  ;;  %v604_v4 = vld [vmem:[%s2445_s3 + $0x180] sm:$0xff] }
  0x4a   : > { %679 = vmatpush2.msra.mxu1 %v604_v4 }
  0x4b   : > { %680 = vmatprep.subr.mxu1 %v603_v5 }
  0x4c   : > { %1363 = vmatmul.mubr.msk.f32.gmra.mxu0 %vm314_vm0, %v297_v0  ;;  %681 = vmatpush2.msra.mxu1 %v602_v6 }
  0x4d   : > { %682 = vmatprep.subr.mxu1 %v601_v7 }
  0x4e   : > { %683 = vmatpush2.msra.mxu1 %v600_v8 }
  0x4f   : > { %684 = vmatprep.subr.mxu1 %v599_v9 }
  0x50   : > { %685 = vmatpush2.msra.mxu1 %v598_v10 }
  0x51   : > { %686 = vmatprep.subr.mxu1 %v597_v11 }
  0x52   : > { %687 = vmatpush2.msra.mxu1 %v596_v12 }
  0x53   : > { %688 = vmatprep.subr.mxu1 %v595_v13 }
  0x54   : > { %689 = vmatpush2.msra.mxu1 %v594_v14 }
  0x55   : > { %690 = vmatprep.subr.mxu1 %v593_v15 }
  0x56   : > { %691 = vmatpush2.msra.mxu1 %v592_v16 }
  0x57   : > { %692 = vmatprep.subr.mxu1 %v591_v17 }
  0x58   : > { %693 = vmatpush2.msra.mxu1 %v590_v18 }
  0x59   : > { %694 = vmatprep.subr.mxu1 %v589_v19 }
  0x5a   : > { %695 = vmatpush2.msra.mxu1 %v588_v20 }
  0xd0   : > { %v429_v51 = vpop.f32.mrf.mxu0 }
  0xd1   : > { %v430_v52 = vadd.f32 %v429_v51, %v2047_v49 }
  0xd2   : > { %v431_v53 = vpop.f32.mrf.mxu0 }
  0xd3   : > { %v432_v54 = vadd.f32 %v431_v53, %v2051_v50 }
  0xd4   : > { %v435_v55 = vpop.f32.mrf.mxu0 }
  0xd5   : > { %1457 = vtanh.f32 %v432_v54  ;;  %v436_v56 = vadd.f32 %v435_v55, %v2047_v49 }
  0xd6   : > { %1459 = vtanh.f32 %v430_v52  ;;  %v437_v57 = vpop.f32.mrf.mxu0 }
  0xd7   : > { %v438_v58 = vadd.f32 %v437_v57, %v2051_v50 }
  0xd8   : > { %v441_v59 = vpop.f32.mrf.mxu0 }
  0xd9   : > { %1461 = vtanh.f32 %v438_v58  ;;  %v442_v60 = vadd.f32 %v441_v59, %v2047_v49 }
  0xda   : > { %1463 = vtanh.f32 %v436_v56  ;;  %v443_v61 = vpop.f32.mrf.mxu0 }
  0xdb   : > { %v444_v62 = vadd.f32 %v443_v61, %v2051_v50 }
  0xdc   : > { %v447_v63 = vpop.f32.mrf.mxu0 }
  0xdd   : > { %1465 = vtanh.f32 %v444_v62  ;;  %v448_v0 = vadd.f32 %v447_v63, %v2047_v49 }
  0xde   : > { %1467 = vtanh.f32 %v442_v60  ;;  %v449_v1 = vpop.f32.mrf.mxu0 }
  0xdf   : > { %v450_v2 = vadd.f32 %v449_v1, %v2051_v50 }
  0xe0   : > { %v453_v3 = vpop.f32.mrf.mxu0 }
  0xe1   : > { %1469 = vtanh.f32 %v450_v2  ;;  %v454_v5 = vadd.f32 %v453_v3, %v2047_v49 }
  0xe2   : > { %v1458_v4 = vpop.eup %1457  ;;  %1471 = vtanh.f32 %v448_v0  ;;  %v455_v6 = vpop.f32.mrf.mxu0 }
  0xe3   : > { %v1460_v7 = vpop.eup %1459  ;;  %v456_v8 = vadd.f32 %v455_v6, %v2051_v50  ;;  %696 = vmatprep.mubr.f32.mxu1 %v1458_v4 }
  0xe4   : > { %v459_v9 = vpop.f32.mrf.mxu0  ;;  %697 = vmatmul.mubr.f32.vlgmr.msra.gmra.mxu1 %v1460_v7 }
  0xe5   : > { %1473 = vtanh.f32 %v456_v8  ;;  %v460_v11 = vadd.f32 %v459_v9, %v2047_v49 }
  0xe6   : > { %v1462_v10 = vpop.eup %1461  ;;  %1475 = vtanh.f32 %v454_v5  ;;  %v461_v12 = vpop.f32.mrf.mxu0 }
  0xe7   : > { %v1464_v13 = vpop.eup %1463  ;;  %v462_v14 = vadd.f32 %v461_v12, %v2051_v50  ;;  %702 = vmatprep.mubr.f32.mxu1 %v1462_v10 }
  0xe8   : > { %v465_v15 = vpop.f32.mrf.mxu0  ;;  %703 = vmatmul.mubr.f32.gmra.mxu1 %v1464_v13 }
  0xe9   : > { %1477 = vtanh.f32 %v462_v14  ;;  %v466_v17 = vadd.f32 %v465_v15, %v2047_v49 }
  0xea   : > { %v1466_v16 = vpop.eup %1465  ;;  %1479 = vtanh.f32 %v460_v11  ;;  %v467_v18 = vpop.f32.mrf.mxu0 }
  0xeb   : > { %v1468_v19 = vpop.eup %1467  ;;  %v468_v20 = vadd.f32 %v467_v18, %v2051_v50  ;;  %708 = vmatprep.mubr.f32.mxu1 %v1466_v16 }
  0xec   : > { %v471_v21 = vpop.f32.mrf.mxu0  ;;  %709 = vmatmul.mubr.f32.gmra.mxu1 %v1468_v19 }
  0xed   : > { %1481 = vtanh.f32 %v468_v20  ;;  %v472_v23 = vadd.f32 %v471_v21, %v2047_v49 }
  0xee   : > { %v1470_v22 = vpop.eup %1469  ;;  %1483 = vtanh.f32 %v466_v17  ;;  %v473_v24 = vpop.f32.mrf.mxu0 }
  0xef   : > { %v1472_v25 = vpop.eup %1471  ;;  %v474_v26 = vadd.f32 %v473_v24, %v2051_v50  ;;  %714 = vmatprep.mubr.f32.mxu1 %v1470_v22  ;;  %v828_v24 = vld [vmem:[%s2447_s5 + $0x18] sm:$0xff] }
  0xf0   : > { %v477_v27 = vpop.f32.mrf.mxu0  ;;  %715 = vmatmul.mubr.f32.gmra.mxu1 %v1472_v25  ;;  %v843_v25 = vld [vmem:[%s2447_s5 + $0x90] sm:$0xff] }
  0xf1   : > { %1485 = vtanh.f32 %v474_v26  ;;  %v478_v29 = vadd.f32 %v477_v27, %v2047_v49  ;;  %v827_v26 = vld [vmem:[%s2447_s5 + $0x10] sm:$0xff]  ;;  %v842_v27 = vld [vmem:[%s2447_s5 + $0x88] sm:$0xff] }
  0xf2   : > { %v1474_v28 = vpop.eup %1473  ;;  %1487 = vtanh.f32 %v472_v23  ;;  %v479_v30 = vpop.f32.mrf.mxu0  ;;  %v844_v23 = vld [vmem:[%s2447_s5 + $0x98] sm:$0xff] }
  0xf3   : > { %v1476_v31 = vpop.eup %1475  ;;  %v480_v32 = vadd.f32 %v479_v30, %v2051_v50  ;;  %720 = vmatprep.mubr.f32.mxu1 %v1474_v28  ;;  %v826_v28 = vld [vmem:[%s2447_s5 + $0x8] sm:$0xff]  ;;  %v825_v30 = vld [vmem:[%s2447_s5] sm:$0xff] }
  0xf4   : > { %v483_v33 = vpop.f32.mrf.mxu0  ;;  %721 = vmatmul.mubr.f32.gmra.mxu1 %v1476_v31  ;;  %v620_v31 = vld [vmem:[%s2446_s4] sm:$0x3] }
  0xf5   : > { %1489 = vtanh.f32 %v480_v32  ;;  %v484_v35 = vadd.f32 %v483_v33, %v2047_v49  ;;  %v2117_v32 = vrot.slane %v620_v31, %v306_v46  ;;  %v2121_v33 = vrot.slane %v620_v31, %v310_v48 }
  0xf6   : > { %v1478_v34 = vpop.eup %1477  ;;  %1491 = vtanh.f32 %v478_v29  ;;  %v485_v36 = vpop.f32.mrf.mxu0  ;;  %v841_v29 = vld [vmem:[%s2447_s5 + $0x80] sm:$0xff] }
  0xf7   : > { %v1480_v37 = vpop.eup %1479  ;;  %v486_v38 = vadd.f32 %v485_v36, %v2051_v50  ;;  %726 = vmatprep.mubr.f32.mxu1 %v1478_v34 }
  0xf8   : > { %v489_v39 = vpop.f32.mrf.mxu0  ;;  %727 = vmatmul.mubr.f32.gmra.mxu1 %v1480_v37 }
  0xf9   : > { %1493 = vtanh.f32 %v486_v38  ;;  %v490_v41 = vadd.f32 %v489_v39, %v2047_v49 }
  0xfa   : > { %v1482_v40 = vpop.eup %1481  ;;  %1495 = vtanh.f32 %v484_v35  ;;  %v491_v42 = vpop.f32.mrf.mxu0 }
  0xfb   : > { %v1484_v43 = vpop.eup %1483  ;;  %v492_v44 = vadd.f32 %v491_v42, %v2051_v50  ;;  %732 = vmatprep.mubr.f32.mxu1 %v1482_v40 }
  0xfc   : > { %v495_v47 = vpop.f32.mrf.mxu0  ;;  %733 = vmatmul.mubr.f32.gmra.mxu1 %v1484_v43 }
  0xfd   : > { %1497 = vtanh.f32 %v492_v44  ;;  %v496_v52 = vadd.f32 %v495_v47, %v2047_v49 }
  0xfe   : > { %v1486_v51 = vpop.eup %1485  ;;  %1499 = vtanh.f32 %v490_v41  ;;  %v497_v53 = vpop.f32.mrf.mxu0 }
  0xff   : > { %v1488_v54 = vpop.eup %1487  ;;  %v498_v55 = vadd.f32 %v497_v53, %v2051_v50  ;;  %738 = vmatprep.mubr.f32.mxu1 %v1486_v51 }
 0x100   : > { %v501_v56 = vpop.f32.mrf.mxu0  ;;  %739 = vmatmul.mubr.f32.gmra.mxu1 %v1488_v54 }
 0x101   : > { %1501 = vtanh.f32 %v498_v55  ;;  %v502_v58 = vadd.f32 %v501_v56, %v2047_v49 }
 0x102   : > { %v1490_v57 = vpop.eup %1489  ;;  %1503 = vtanh.f32 %v496_v52  ;;  %v503_v59 = vpop.f32.mrf.mxu0 }
 0x103   : > { %v1492_v60 = vpop.eup %1491  ;;  %v504_v61 = vadd.f32 %v503_v59, %v2051_v50  ;;  %744 = vmatprep.mubr.f32.mxu1 %v1490_v57 }
 0x104   : > { %v507_v62 = vpop.f32.mrf.mxu0  ;;  %745 = vmatmul.mubr.f32.gmra.mxu1 %v1492_v60 }
 0x105   : > { %1505 = vtanh.f32 %v504_v61  ;;  %v508_v0 = vadd.f32 %v507_v62, %v2047_v49 }
 0x106   : > { %v1494_v63 = vpop.eup %1493  ;;  %1507 = vtanh.f32 %v502_v58  ;;  %v509_v1 = vpop.f32.mrf.mxu0 }
 0x107   : > { %v1496_v2 = vpop.eup %1495  ;;  %v510_v3 = vadd.f32 %v509_v1, %v2051_v50  ;;  %750 = vmatprep.mubr.f32.mxu1 %v1494_v63 }
 0x108   : > { %v513_v4 = vpop.f32.mrf.mxu0  ;;  %751 = vmatmul.mubr.f32.gmra.mxu1 %v1496_v2 }
 0x109   : > { %1509 = vtanh.f32 %v510_v3  ;;  %v514_v6 = vadd.f32 %v513_v4, %v2047_v49 }
 0x10a   : > { %v1498_v5 = vpop.eup %1497  ;;  %1511 = vtanh.f32 %v508_v0  ;;  %v515_v7 = vpop.f32.mrf.mxu0 }
 0x10b   : > { %v1500_v8 = vpop.eup %1499  ;;  %v516_v9 = vadd.f32 %v515_v7, %v2051_v50  ;;  %756 = vmatprep.mubr.f32.mxu1 %v1498_v5 }
 0x10c   : > { %v519_v10 = vpop.f32.mrf.mxu0  ;;  %757 = vmatmul.mubr.f32.gmra.mxu1 %v1500_v8 }
 0x10d   : > { %1513 = vtanh.f32 %v516_v9  ;;  %v520_v12 = vadd.f32 %v519_v10, %v2047_v49 }
 0x10e   : > { %v1502_v11 = vpop.eup %1501  ;;  %1515 = vtanh.f32 %v514_v6  ;;  %v521_v13 = vpop.f32.mrf.mxu0 }
 0x10f   : > { %v1504_v14 = vpop.eup %1503  ;;  %v522_v15 = vadd.f32 %v521_v13, %v2051_v50  ;;  %762 = vmatprep.mubr.f32.mxu1 %v1502_v11  ;;  %v829_v50 = vld [vmem:[%s2447_s5 + $0x20] sm:$0xff] }
 0x110   : > { %763 = vmatmul.mubr.f32.gmra.mxu1 %v1504_v14  ;;  %1390 = vmatpush3.msra.mxu0 %v829_v50 }
 0x111   : > { %1517 = vtanh.f32 %v522_v15  ;;  %1391 = vmatprep.subr.mxu0 %v844_v23 }
 0x112   : > { %v1506_v16 = vpop.eup %1505  ;;  %1519 = vtanh.f32 %v520_v12  ;;  %1392 = vmatpush3.msra.mxu0 %v828_v24 }
 0x113   : > { %v1508_v17 = vpop.eup %1507  ;;  %768 = vmatprep.mubr.f32.mxu1 %v1506_v16  ;;  %1393 = vmatprep.subr.mxu0 %v843_v25 }
 0x114   : > { %769 = vmatmul.mubr.f32.gmra.mxu1 %v1508_v17  ;;  %1394 = vmatpush3.msra.mxu0 %v827_v26 }
 0x115   : > { %1395 = vmatprep.subr.mxu0 %v842_v27 }
 0x116   : > { %v1510_v18 = vpop.eup %1509  ;;  %1396 = vmatpush3.msra.mxu0 %v826_v28 }
 0x117   : > { %v1512_v19 = vpop.eup %1511  ;;  %774 = vmatprep.mubr.f32.mxu1 %v1510_v18  ;;  %1397 = vmatprep.subr.mxu0 %v841_v29 }
 0x118   : > { %775 = vmatmul.mubr.f32.gmra.mxu1 %v1512_v19  ;;  %1398 = vmatpush3.msra.mxu0 %v825_v30 }
 0x11a   : > { %v1514_v20 = vpop.eup %1513 }
 0x11b   : > { %v1516_v21 = vpop.eup %1515  ;;  %780 = vmatprep.mubr.f32.mxu1 %v1514_v20 }
 0x11c   : > { %781 = vmatmul.mubr.f32.gmra.mxu1 %v1516_v21 }
 0x11e   : > { %v1518_v49 = vpop.eup %1517 }
 0x11f   : > { %v1520_v22 = vpop.eup %1519  ;;  %786 = vmatprep.mubr.f32.mxu1 %v1518_v49 }
 0x120   : > { %787 = vmatmul.mubr.f32.gmra.mxu1 %v1520_v22 }
 0x1a4   : > { %v698_v34 = vpop.f32.mrf.mxu1 }
 0x1a5   : > { %v699_v35 = vadd.f32 %v698_v34, %v2117_v32 }
 0x1a6   : > { %v700_v36 = vpop.f32.mrf.mxu1 }
 0x1a7   : > { %v701_v37 = vadd.f32 %v700_v36, %v2121_v33 }
 0x1a8   : > { %v704_v38 = vpop.f32.mrf.mxu1 }
 0x1a9   : > { %1521 = vtanh.f32 %v701_v37  ;;  %v705_v39 = vadd.f32 %v704_v38, %v2117_v32 }
 0x1aa   : > { %1523 = vtanh.f32 %v699_v35  ;;  %v706_v40 = vpop.f32.mrf.mxu1 }
 0x1ab   : > { %v707_v41 = vadd.f32 %v706_v40, %v2121_v33 }
 0x1ac   : > { %v710_v46 = vpop.f32.mrf.mxu1 }
 0x1ad   : > { %1525 = vtanh.f32 %v707_v41  ;;  %v711_v45 = vadd.f32 %v710_v46, %v2117_v32 }
 0x1ae   : > { %1527 = vtanh.f32 %v705_v39  ;;  %v712_v48 = vpop.f32.mrf.mxu1 }
 0x1af   : > { %v713_v42 = vadd.f32 %v712_v48, %v2121_v33 }
 0x1b0   : > { %v716_v43 = vpop.f32.mrf.mxu1 }
 0x1b1   : > { %1529 = vtanh.f32 %v713_v42  ;;  %v717_v44 = vadd.f32 %v716_v43, %v2117_v32 }
 0x1b2   : > { %1531 = vtanh.f32 %v711_v45  ;;  %v718_v47 = vpop.f32.mrf.mxu1 }
 0x1b3   : > { %v719_v51 = vadd.f32 %v718_v47, %v2121_v33 }
 0x1b4   : > { %v722_v52 = vpop.f32.mrf.mxu1 }
 0x1b5   : > { %1533 = vtanh.f32 %v719_v51  ;;  %v723_v54 = vadd.f32 %v722_v52, %v2117_v32 }
 0x1b6   : > { %v1522_v53 = vpop.eup %1521  ;;  %1535 = vtanh.f32 %v717_v44  ;;  %v724_v55 = vpop.f32.mrf.mxu1 }
 0x1b7   : > { %v1524_v56 = vpop.eup %1523  ;;  %v725_v57 = vadd.f32 %v724_v55, %v2121_v33  ;;  %928 = vmatprep.mubr.f32.mxu0 %v1522_v53 }
 0x1b8   : > { %v728_v58 = vpop.f32.mrf.mxu1  ;;  %929 = vmatmul.mubr.f32.vlgmr.msra.gmra.mxu0 %v1524_v56 }
 0x1b9   : > { %1537 = vtanh.f32 %v725_v57  ;;  %v729_v60 = vadd.f32 %v728_v58, %v2117_v32 }
 0x1ba   : > { %v1526_v59 = vpop.eup %1525  ;;  %1539 = vtanh.f32 %v723_v54  ;;  %v730_v61 = vpop.f32.mrf.mxu1 }
 0x1bb   : > { %v1528_v62 = vpop.eup %1527  ;;  %v731_v63 = vadd.f32 %v730_v61, %v2121_v33  ;;  %933 = vmatprep.mubr.f32.mxu0 %v1526_v59 }
 0x1bc   : > { %v734_v0 = vpop.f32.mrf.mxu1  ;;  %934 = vmatmul.mubr.f32.gmra.mxu0 %v1528_v62 }
 0x1bd   : > { %1541 = vtanh.f32 %v731_v63  ;;  %v735_v2 = vadd.f32 %v734_v0, %v2117_v32 }
 0x1be   : > { %v1530_v1 = vpop.eup %1529  ;;  %1543 = vtanh.f32 %v729_v60  ;;  %v736_v3 = vpop.f32.mrf.mxu1 }
 0x1bf   : > { %v1532_v4 = vpop.eup %1531  ;;  %v737_v5 = vadd.f32 %v736_v3, %v2121_v33  ;;  %938 = vmatprep.mubr.f32.mxu0 %v1530_v1 }
 0x1c0   : > { %v740_v6 = vpop.f32.mrf.mxu1  ;;  %939 = vmatmul.mubr.f32.gmra.mxu0 %v1532_v4 }
 0x1c1   : > { %1545 = vtanh.f32 %v737_v5  ;;  %v741_v8 = vadd.f32 %v740_v6, %v2117_v32  ;;  %v2158_v5 = vld [vmem:[%s2448_s6] ss:$0 sm:$0xff] }
 0x1c2   : > { %v1534_v7 = vpop.eup %1533  ;;  %1547 = vtanh.f32 %v735_v2  ;;  %v742_v9 = vpop.f32.mrf.mxu1 }
 0x1c3   : > { %v1536_v10 = vpop.eup %1535  ;;  %v743_v11 = vadd.f32 %v742_v9, %v2121_v33  ;;  %943 = vmatprep.mubr.f32.mxu0 %v1534_v7 }
 0x1c4   : > { %v746_v12 = vpop.f32.mrf.mxu1  ;;  %944 = vmatmul.mubr.f32.gmra.mxu0 %v1536_v10 }
 0x1c5   : > { %1549 = vtanh.f32 %v743_v11  ;;  %v747_v14 = vadd.f32 %v746_v12, %v2117_v32 }
 0x1c6   : > { %v1538_v13 = vpop.eup %1537  ;;  %1551 = vtanh.f32 %v741_v8  ;;  %v748_v15 = vpop.f32.mrf.mxu1 }
 0x1c7   : > { %v1540_v16 = vpop.eup %1539  ;;  %v749_v17 = vadd.f32 %v748_v15, %v2121_v33  ;;  %948 = vmatprep.mubr.f32.mxu0 %v1538_v13 }
 0x1c8   : > { %v752_v18 = vpop.f32.mrf.mxu1  ;;  %949 = vmatmul.mubr.f32.gmra.mxu0 %v1540_v16 }
 0x1c9   : > { %1553 = vtanh.f32 %v749_v17  ;;  %v753_v20 = vadd.f32 %v752_v18, %v2117_v32 }
 0x1ca   : > { %v1542_v19 = vpop.eup %1541  ;;  %1555 = vtanh.f32 %v747_v14  ;;  %v754_v21 = vpop.f32.mrf.mxu1 }
 0x1cb   : > { %v1544_v49 = vpop.eup %1543  ;;  %v755_v22 = vadd.f32 %v754_v21, %v2121_v33  ;;  %953 = vmatprep.mubr.f32.mxu0 %v1542_v19 }
 0x1cc   : > { %v758_v50 = vpop.f32.mrf.mxu1  ;;  %954 = vmatmul.mubr.f32.gmra.mxu0 %v1544_v49 }
 0x1cd   : > { %1557 = vtanh.f32 %v755_v22  ;;  %v759_v24 = vadd.f32 %v758_v50, %v2117_v32 }
 0x1ce   : > { %v1546_v23 = vpop.eup %1545  ;;  %1559 = vtanh.f32 %v753_v20  ;;  %v760_v25 = vpop.f32.mrf.mxu1 }
 0x1cf   : > { %v1548_v26 = vpop.eup %1547  ;;  %v761_v27 = vadd.f32 %v760_v25, %v2121_v33  ;;  %958 = vmatprep.mubr.f32.mxu0 %v1546_v23 }
 0x1d0   : > { %v764_v28 = vpop.f32.mrf.mxu1  ;;  %959 = vmatmul.mubr.f32.gmra.mxu0 %v1548_v26 }
 0x1d1   : > { %1561 = vtanh.f32 %v761_v27  ;;  %v765_v30 = vadd.f32 %v764_v28, %v2117_v32 }
 0x1d2   : > { %v1550_v29 = vpop.eup %1549  ;;  %1563 = vtanh.f32 %v759_v24  ;;  %v766_v31 = vpop.f32.mrf.mxu1 }
 0x1d3   : > { %v1552_v34 = vpop.eup %1551  ;;  %v767_v35 = vadd.f32 %v766_v31, %v2121_v33  ;;  %963 = vmatprep.mubr.f32.mxu0 %v1550_v29 }
 0x1d4   : > { %v770_v36 = vpop.f32.mrf.mxu1  ;;  %964 = vmatmul.mubr.f32.gmra.mxu0 %v1552_v34 }
 0x1d5   : > { %1565 = vtanh.f32 %v767_v35  ;;  %v771_v38 = vadd.f32 %v770_v36, %v2117_v32 }
 0x1d6   : > { %v1554_v37 = vpop.eup %1553  ;;  %1567 = vtanh.f32 %v765_v30  ;;  %v772_v39 = vpop.f32.mrf.mxu1 }
 0x1d7   : > { %v1556_v40 = vpop.eup %1555  ;;  %v773_v41 = vadd.f32 %v772_v39, %v2121_v33  ;;  %968 = vmatprep.mubr.f32.mxu0 %v1554_v37 }
 0x1d8   : > { %v776_v46 = vpop.f32.mrf.mxu1  ;;  %969 = vmatmul.mubr.f32.gmra.mxu0 %v1556_v40 }
 0x1d9   : > { %1569 = vtanh.f32 %v773_v41  ;;  %v777_v48 = vadd.f32 %v776_v46, %v2117_v32 }
 0x1da   : > { %v1558_v45 = vpop.eup %1557  ;;  %1571 = vtanh.f32 %v771_v38  ;;  %v778_v42 = vpop.f32.mrf.mxu1 }
 0x1db   : > { %v1560_v43 = vpop.eup %1559  ;;  %v779_v44 = vadd.f32 %v778_v42, %v2121_v33  ;;  %973 = vmatprep.mubr.f32.mxu0 %v1558_v45 }
 0x1dc   : > { %v782_v47 = vpop.f32.mrf.mxu1  ;;  %974 = vmatmul.mubr.f32.gmra.mxu0 %v1560_v43 }
 0x1dd   : > { %1573 = vtanh.f32 %v779_v44  ;;  %v783_v52 = vadd.f32 %v782_v47, %v2117_v32 }
 0x1de   : > { %v1562_v51 = vpop.eup %1561  ;;  %1575 = vtanh.f32 %v777_v48  ;;  %v784_v53 = vpop.f32.mrf.mxu1 }
 0x1df   : > { %v1564_v54 = vpop.eup %1563  ;;  %v785_v55 = vadd.f32 %v784_v53, %v2121_v33  ;;  %978 = vmatprep.mubr.f32.mxu0 %v1562_v51 }
 0x1e0   : > { %v788_v56 = vpop.f32.mrf.mxu1  ;;  %979 = vmatmul.mubr.f32.gmra.mxu0 %v1564_v54 }
 0x1e1   : > { %1577 = vtanh.f32 %v785_v55  ;;  %v789_v58 = vadd.f32 %v788_v56, %v2117_v32 }
 0x1e2   : > { %v1566_v57 = vpop.eup %1565  ;;  %1579 = vtanh.f32 %v783_v52  ;;  %v790_v59 = vpop.f32.mrf.mxu1 }
 0x1e3   : > { %v1568_v60 = vpop.eup %1567  ;;  %v791_v61 = vadd.f32 %v790_v59, %v2121_v33  ;;  %983 = vmatprep.mubr.f32.mxu0 %v1566_v57 }
 0x1e4   : > { %984 = vmatmul.mubr.f32.gmra.mxu0 %v1568_v60 }
 0x1e5   : > { %1581 = vtanh.f32 %v791_v61 }
 0x1e6   : > { %v1570_v62 = vpop.eup %1569  ;;  %1583 = vtanh.f32 %v789_v58 }
 0x1e7   : > { %v1572_v63 = vpop.eup %1571  ;;  %988 = vmatprep.mubr.f32.mxu0 %v1570_v62 }
 0x1e8   : > { %989 = vmatmul.mubr.f32.gmra.mxu0 %v1572_v63 }
 0x1ea   : > { %v1574_v0 = vpop.eup %1573 }
 0x1eb   : > { %v1576_v1 = vpop.eup %1575  ;;  %993 = vmatprep.mubr.f32.mxu0 %v1574_v0 }
 0x1ec   : > { %994 = vmatmul.mubr.f32.gmra.mxu0 %v1576_v1 }
 0x1ee   : > { %v1578_v2 = vpop.eup %1577 }
 0x1ef   : > { %v1580_v3 = vpop.eup %1579  ;;  %998 = vmatprep.mubr.f32.mxu0 %v1578_v2 }
 0x1f0   : > { %999 = vmatmul.mubr.f32.gmra.mxu0 %v1580_v3 }
 0x1f2   : > { %v1582_v32 = vpop.eup %1581 }
 0x1f3   : > { %v1584_v4 = vpop.eup %1583  ;;  %1003 = vmatprep.mubr.f32.mxu0 %v1582_v32 }
 0x1f4   : > { %1004 = vmatmul.mubr.f32.gmra.mxu0 %v1584_v4 }
 0x278   : > { %v1399_v33 = vpop.f32.mrf.mxu0 }
 0x27a   : > { %v1400_v6 = vpop.f32.mrf.mxu0 }
 0x27b   : > { %v1401_v7 = vadd.f32 %v1400_v6, %v1399_v33 }
 0x27c   : > { %v1402_v8 = vpop.f32.mrf.mxu0 }
 0x27d   : > { %v2168_v9 = vadd.f32 %v1401_v7, %v2158_v5 }
 0x27e   : > { %v1403_v10 = vpop.f32.mrf.mxu0 }
 0x27f   : > { %1186 = vst.msk [vmem:[%s2165_s18] sm:$0xff] %vm1009_vm1, %v2168_v9  ;;  %v1404_v11 = vadd.f32 %v1403_v10, %v1402_v8  ;;  %v1010_v12 = vsel %vm1009_vm1, %v2168_v9, -inf }
 0x280   : > { %v1405_v13 = vpop.f32.mrf.mxu0  ;;  %1011 = vmax.xlane.f32.xlu0 %v1010_v12 }
 0x281   : > { %v2176_v14 = vadd.f32 %v1404_v11, %v2158_v5 }
 0x282   : > { %v1406_v15 = vpop.f32.mrf.mxu0 }
 0x283   : > { %1187 = vst.msk [vmem:[%s2165_s18 + $0x8] sm:$0xff] %vm1009_vm1, %v2176_v14  ;;  %v1407_v16 = vadd.f32 %v1406_v15, %v1405_v13  ;;  %v1013_v17 = vsel %vm1009_vm1, %v2176_v14, -inf }
 0x284   : > { %v1408_v18 = vpop.f32.mrf.mxu0  ;;  %1014 = vmax.xlane.f32.xlu0 %v1013_v17 }
 0x285   : > { %v2184_v19 = vadd.f32 %v1407_v16, %v2158_v5 }
 0x286   : > { %v1409_v20 = vpop.f32.mrf.mxu0 }
 0x287   : > { %1188 = vst.msk [vmem:[%s2165_s18 + $0x10] sm:$0xff] %vm1009_vm1, %v2184_v19  ;;  %v1410_v21 = vadd.f32 %v1409_v20, %v1408_v18  ;;  %v1016_v49 = vsel %vm1009_vm1, %v2184_v19, -inf }
 0x288   : > { %v1411_v22 = vpop.f32.mrf.mxu0  ;;  %1017 = vmax.xlane.f32.xlu1 %v1016_v49 }
 0x289   : > { %v2192_v50 = vadd.f32 %v1410_v21, %v2158_v5 }
 0x28a   : > { %v1412_v23 = vpop.f32.mrf.mxu0 }
 0x28b   : > { %1189 = vst.msk [vmem:[%s2165_s18 + $0x18] sm:$0xff] %vm1009_vm1, %v2192_v50  ;;  %v1413_v24 = vadd.f32 %v1412_v23, %v1411_v22  ;;  %v1019_v25 = vsel %vm1009_vm1, %v2192_v50, -inf }
 0x28c   : > { %v1414_v26 = vpop.f32.mrf.mxu0  ;;  %1020 = vmax.xlane.f32.xlu1 %v1019_v25 }
 0x28d   : > { %v2200_v27 = vadd.f32 %v1413_v24, %v2158_v5 }
 0x28e   : > { %v1415_v28 = vpop.f32.mrf.mxu0 }
 0x28f   : > { %1190 = vst.msk [vmem:[%s2165_s18 + $0x20] sm:$0xff] %vm1009_vm1, %v2200_v27  ;;  %v1416_v29 = vadd.f32 %v1415_v28, %v1414_v26  ;;  %v1022_v30 = vsel %vm1009_vm1, %v2200_v27, -inf }
 0x290   : > { %v1417_v31 = vpop.f32.mrf.mxu0  ;;  %1023 = vmax.xlane.f32.xlu0 %v1022_v30 }
 0x291   : > { %v2208_v34 = vadd.f32 %v1416_v29, %v2158_v5 }
 0x292   : > { %v1418_v35 = vpop.f32.mrf.mxu0 }
 0x293   : > { %1191 = vst.msk [vmem:[%s2165_s18 + $0x28] sm:$0xff] %vm1009_vm1, %v2208_v34  ;;  %v1419_v36 = vadd.f32 %v1418_v35, %v1417_v31  ;;  %v1025_v37 = vsel %vm1009_vm1, %v2208_v34, -inf }
 0x294   : > { %v1420_v38 = vpop.f32.mrf.mxu0  ;;  %1026 = vmax.xlane.f32.xlu1 %v1025_v37 }
 0x295   : > { %v2216_v39 = vadd.f32 %v1419_v36, %v2158_v5 }
 0x296   : > { %v1421_v40 = vpop.f32.mrf.mxu0 }
 0x297   : > { %1192 = vst.msk [vmem:[%s2165_s18 + $0x30] sm:$0xff] %vm1009_vm1, %v2216_v39  ;;  %v1422_v41 = vadd.f32 %v1421_v40, %v1420_v38  ;;  %v1028_v46 = vsel %vm1009_vm1, %v2216_v39, -inf }
 0x298   : > { %v1423_v45 = vpop.f32.mrf.mxu0  ;;  %1029 = vmax.xlane.f32.xlu0 %v1028_v46 }
 0x299   : > { %v2224_v48 = vadd.f32 %v1422_v41, %v2158_v5 }
 0x29a   : > { %v1424_v42 = vpop.f32.mrf.mxu0 }
 0x29b   : > { %1193 = vst.msk [vmem:[%s2165_s18 + $0x38] sm:$0xff] %vm1009_vm1, %v2224_v48  ;;  %v1425_v43 = vadd.f32 %v1424_v42, %v1423_v45  ;;  %v1031_v44 = vsel %vm1009_vm1, %v2224_v48, -inf }
 0x29c   : > { %v1426_v47 = vpop.f32.mrf.mxu0  ;;  %1032 = vmax.xlane.f32.xlu1 %v1031_v44 }
 0x29d   : > { %v2232_v51 = vadd.f32 %v1425_v43, %v2158_v5 }
 0x29e   : > { %v1427_v52 = vpop.f32.mrf.mxu0 }
 0x29f   : > { %1194 = vst.msk [vmem:[%s2165_s18 + $0x40] sm:$0xff] %vm1009_vm1, %v2232_v51  ;;  %v1428_v53 = vadd.f32 %v1427_v52, %v1426_v47  ;;  %v1034_v54 = vsel %vm1009_vm1, %v2232_v51, -inf }
 0x2a0   : > { %v1429_v55 = vpop.f32.mrf.mxu0  ;;  %1035 = vmax.xlane.f32.xlu0 %v1034_v54 }
 0x2a1   : > { %v2240_v56 = vadd.f32 %v1428_v53, %v2158_v5 }
 0x2a2   : > { %v1430_v57 = vpop.f32.mrf.mxu0 }
 0x2a3   : > { %1195 = vst.msk [vmem:[%s2165_s18 + $0x48] sm:$0xff] %vm1009_vm1, %v2240_v56  ;;  %v1431_v58 = vadd.f32 %v1430_v57, %v1429_v55  ;;  %v1037_v59 = vsel %vm1009_vm1, %v2240_v56, -inf }
 0x2a4   : > { %v1432_v60 = vpop.f32.mrf.mxu0  ;;  %1038 = vmax.xlane.f32.xlu1 %v1037_v59 }
 0x2a5   : > { %v2248_v61 = vadd.f32 %v1431_v58, %v2158_v5 }
 0x2a6   : > { %v1433_v62 = vpop.f32.mrf.mxu0 }
 0x2a7   : > { %1196 = vst.msk [vmem:[%s2165_s18 + $0x50] sm:$0xff] %vm1009_vm1, %v2248_v61  ;;  %v1434_v63 = vadd.f32 %v1433_v62, %v1432_v60  ;;  %v1040_v0 = vsel %vm1009_vm1, %v2248_v61, -inf }
 0x2a8   : > { %v1435_v1 = vpop.f32.mrf.mxu0  ;;  %1041 = vmax.xlane.f32.xlu0 %v1040_v0 }
 0x2a9   : > { %v2256_v2 = vadd.f32 %v1434_v63, %v2158_v5 }
 0x2aa   : > { %v1436_v3 = vpop.f32.mrf.mxu0 }
 0x2ab   : > { %1197 = vst.msk [vmem:[%s2165_s18 + $0x58] sm:$0xff] %vm1009_vm1, %v2256_v2  ;;  %v1437_v32 = vadd.f32 %v1436_v3, %v1435_v1  ;;  %v1043_v4 = vsel %vm1009_vm1, %v2256_v2, -inf }
 0x2ac   : > { %v1438_v33 = vpop.f32.mrf.mxu0  ;;  %1044 = vmax.xlane.f32.xlu1 %v1043_v4 }
 0x2ad   : > { %v2264_v6 = vadd.f32 %v1437_v32, %v2158_v5 }
 0x2ae   : > { %v1439_v7 = vpop.f32.mrf.mxu0 }
 0x2af   : > { %1198 = vst.msk [vmem:[%s2165_s18 + $0x60] sm:$0xff] %vm1009_vm1, %v2264_v6  ;;  %v1440_v8 = vadd.f32 %v1439_v7, %v1438_v33  ;;  %v1046_v10 = vsel %vm1009_vm1, %v2264_v6, -inf }
 0x2b0   : > { %v1441_v11 = vpop.f32.mrf.mxu0  ;;  %1047 = vmax.xlane.f32.xlu0 %v1046_v10 }
 0x2b1   : > { %v2272_v12 = vadd.f32 %v1440_v8, %v2158_v5 }
 0x2b2   : > { %v1442_v13 = vpop.f32.mrf.mxu0 }
 0x2b3   : > { %1199 = vst.msk [vmem:[%s2165_s18 + $0x68] sm:$0xff] %vm1009_vm1, %v2272_v12  ;;  %v1443_v15 = vadd.f32 %v1442_v13, %v1441_v11  ;;  %v1049_v16 = vsel %vm1009_vm1, %v2272_v12, -inf }
 0x2b4   : > { %v1444_v17 = vpop.f32.mrf.mxu0  ;;  %1050 = vmax.xlane.f32.xlu1 %v1049_v16 }
 0x2b5   : > { %v2280_v18 = vadd.f32 %v1443_v15, %v2158_v5 }
 0x2b6   : > { %v1445_v20 = vpop.f32.mrf.mxu0 }
 0x2b7   : > { %1200 = vst.msk [vmem:[%s2165_s18 + $0x70] sm:$0xff] %vm1009_vm1, %v2280_v18  ;;  %v1446_v21 = vadd.f32 %v1445_v20, %v1444_v17  ;;  %v1052_v49 = vsel %vm1009_vm1, %v2280_v18, -inf }
 0x2b8   : > { %1053 = vmax.xlane.f32.xlu0 %v1052_v49 }
 0x2b9   : > { %v2288_v22 = vadd.f32 %v1446_v21, %v2158_v5 }
 0x2bb   : > { %1201 = vst.msk [vmem:[%s2165_s18 + $0x78] sm:$0xff] %vm1009_vm1, %v2288_v22  ;;  %v1055_v23 = vsel %vm1009_vm1, %v2288_v22, -inf }
 0x2bc   : > { %1056 = vmax.xlane.f32.xlu1 %v1055_v23 }
 0x309   : > { %v1012_v24 = vpop.xlane.xlu0 %1011 }
 0x30a   : > { %v1058_v25 = vsub.f32 %v2168_v9, %v1012_v24 }
 0x30c   : > { %v1074_v26 = vmul.f32 1.442695, %v1058_v25 }
 0x30d   : > { %v1015_v28 = vpop.xlane.xlu0 %1014 }
 0x30e   : > { %1585 = vpow2.f32 %v1074_v26  ;;  %v1059_v29 = vsub.f32 %v2176_v14, %v1015_v28 }
 0x310   : > { %v1076_v30 = vmul.f32 1.442695, %v1059_v29 }
 0x311   : > { %v1018_v31 = vpop.xlane.xlu1 %1017 }
 0x312   : > { %1587 = vpow2.f32 %v1076_v30  ;;  %v1060_v5 = vsub.f32 %v2184_v19, %v1018_v31 }
 0x314   : > { %v1078_v35 = vmul.f32 1.442695, %v1060_v5 }
 0x315   : > { %v1021_v36 = vpop.xlane.xlu1 %1020 }
 0x316   : > { %1589 = vpow2.f32 %v1078_v35  ;;  %v1061_v37 = vsub.f32 %v2192_v50, %v1021_v36 }
 0x318   : > { %v1080_v38 = vmul.f32 1.442695, %v1061_v37 }
 0x319   : > { %v1024_v40 = vpop.xlane.xlu0 %1023 }
 0x31a   : > { %1591 = vpow2.f32 %v1080_v38  ;;  %v1062_v9 = vsub.f32 %v2200_v27, %v1024_v40 }
 0x31b   : > { %v2300_v41 = vpop.eup %1585 }
 0x31c   : > { %v1082_v46 = vmul.f32 1.442695, %v1062_v9  ;;  %v1106_v14 = vsel %vm1009_vm1, %v2300_v41, 0.0 }
 0x31d   : > { %v1027_v45 = vpop.xlane.xlu1 %1026  ;;  %1107 = vadd.xlane.f32.xlu0 %v1106_v14 }
 0x31e   : > { %1593 = vpow2.f32 %v1082_v46  ;;  %v1063_v19 = vsub.f32 %v2208_v34, %v1027_v45 }
 0x31f   : > { %v2305_v42 = vpop.eup %1587 }
 0x320   : > { %v1084_v43 = vmul.f32 1.442695, %v1063_v19  ;;  %v1109_v50 = vsel %vm1009_vm1, %v2305_v42, 0.0 }
 0x321   : > { %1110 = vadd.xlane.f32.xlu1 %v1109_v50  ;;  %v1030_v44 = vpop.xlane.xlu0 %1029 }
 0x322   : > { %1595 = vpow2.f32 %v1084_v43  ;;  %v1064_v27 = vsub.f32 %v2216_v39, %v1030_v44 }
 0x323   : > { %v2310_v47 = vpop.eup %1589 }
 0x324   : > { %v1086_v52 = vmul.f32 1.442695, %v1064_v27  ;;  %v1112_v53 = vsel %vm1009_vm1, %v2310_v47, 0.0 }
 0x325   : > { %v1033_v54 = vpop.xlane.xlu1 %1032  ;;  %1113 = vadd.xlane.f32.xlu0 %v1112_v53 }
 0x326   : > { %1597 = vpow2.f32 %v1086_v52  ;;  %v1065_v34 = vsub.f32 %v2224_v48, %v1033_v54 }
 0x327   : > { %v2315_v55 = vpop.eup %1591 }
 0x328   : > { %v1088_v57 = vmul.f32 1.442695, %v1065_v34  ;;  %v1115_v58 = vsel %vm1009_vm1, %v2315_v55, 0.0 }
 0x329   : > { %1116 = vadd.xlane.f32.xlu1 %v1115_v58  ;;  %v1036_v59 = vpop.xlane.xlu0 %1035 }
 0x32a   : > { %1599 = vpow2.f32 %v1088_v57  ;;  %v1066_v39 = vsub.f32 %v2232_v51, %v1036_v59 }
 0x32b   : > { %v2320_v60 = vpop.eup %1593 }
 0x32c   : > { %v1090_v62 = vmul.f32 1.442695, %v1066_v39  ;;  %v1118_v63 = vsel %vm1009_vm1, %v2320_v60, 0.0 }
 0x32d   : > { %v1039_v0 = vpop.xlane.xlu1 %1038  ;;  %1119 = vadd.xlane.f32.xlu0 %v1118_v63 }
 0x32e   : > { %1601 = vpow2.f32 %v1090_v62  ;;  %v1067_v48 = vsub.f32 %v2240_v56, %v1039_v0 }
 0x32f   : > { %v2325_v1 = vpop.eup %1595 }
 0x330   : > { %v1092_v3 = vmul.f32 1.442695, %v1067_v48  ;;  %v1121_v32 = vsel %vm1009_vm1, %v2325_v1, 0.0 }
 0x331   : > { %1122 = vadd.xlane.f32.xlu1 %v1121_v32  ;;  %v1042_v4 = vpop.xlane.xlu0 %1041 }
 0x332   : > { %1603 = vpow2.f32 %v1092_v3  ;;  %v1068_v51 = vsub.f32 %v2248_v61, %v1042_v4 }
 0x333   : > { %v2330_v33 = vpop.eup %1597 }
 0x334   : > { %v1094_v7 = vmul.f32 1.442695, %v1068_v51  ;;  %v1124_v8 = vsel %vm1009_vm1, %v2330_v33, 0.0 }
 0x335   : > { %v1045_v10 = vpop.xlane.xlu1 %1044  ;;  %1125 = vadd.xlane.f32.xlu0 %v1124_v8 }
 0x336   : > { %1605 = vpow2.f32 %v1094_v7  ;;  %v1069_v56 = vsub.f32 %v2256_v2, %v1045_v10 }
 0x337   : > { %v2335_v11 = vpop.eup %1599 }
 0x338   : > { %v1096_v13 = vmul.f32 1.442695, %v1069_v56  ;;  %v1127_v15 = vsel %vm1009_vm1, %v2335_v11, 0.0 }
 0x339   : > { %1128 = vadd.xlane.f32.xlu1 %v1127_v15  ;;  %v1048_v16 = vpop.xlane.xlu0 %1047 }
 0x33a   : > { %1607 = vpow2.f32 %v1096_v13  ;;  %v1070_v61 = vsub.f32 %v2264_v6, %v1048_v16 }
 0x33b   : > { %v2340_v17 = vpop.eup %1601 }
 0x33c   : > { %v1098_v20 = vmul.f32 1.442695, %v1070_v61  ;;  %v1130_v21 = vsel %vm1009_vm1, %v2340_v17, 0.0 }
 0x33d   : > { %v1051_v49 = vpop.xlane.xlu1 %1050  ;;  %1131 = vadd.xlane.f32.xlu0 %v1130_v21 }
 0x33e   : > { %1609 = vpow2.f32 %v1098_v20  ;;  %v1071_v2 = vsub.f32 %v2272_v12, %v1051_v49 }
 0x33f   : > { %v2345_v23 = vpop.eup %1603 }
 0x340   : > { %v1100_v24 = vmul.f32 1.442695, %v1071_v2  ;;  %v1133_v25 = vsel %vm1009_vm1, %v2345_v23, 0.0 }
 0x341   : > { %1134 = vadd.xlane.f32.xlu1 %v1133_v25  ;;  %v1054_v26 = vpop.xlane.xlu0 %1053 }
 0x342   : > { %1611 = vpow2.f32 %v1100_v24  ;;  %v1072_v6 = vsub.f32 %v2280_v18, %v1054_v26 }
 0x343   : > { %v2350_v28 = vpop.eup %1605 }
 0x344   : > { %v1102_v29 = vmul.f32 1.442695, %v1072_v6  ;;  %v1136_v30 = vsel %vm1009_vm1, %v2350_v28, 0.0 }
 0x345   : > { %v1057_v31 = vpop.xlane.xlu1 %1056  ;;  %1137 = vadd.xlane.f32.xlu0 %v1136_v30 }
 0x346   : > { %1613 = vpow2.f32 %v1102_v29  ;;  %v1073_v12 = vsub.f32 %v2288_v22, %v1057_v31 }
 0x347   : > { %v2355_v5 = vpop.eup %1607 }
 0x348   : > { %v1104_v35 = vmul.f32 1.442695, %v1073_v12  ;;  %v1139_v36 = vsel %vm1009_vm1, %v2355_v5, 0.0 }
 0x349   : > { %1140 = vadd.xlane.f32.xlu1 %v1139_v36 }
 0x34a   : > { %1615 = vpow2.f32 %v1104_v35 }
 0x34b   : > { %v2359_v18 = vpop.eup %1609 }
 0x34c   : > { %v1142_v37 = vsel %vm1009_vm1, %v2359_v18, 0.0 }
 0x34d   : > { %1143 = vadd.xlane.f32.xlu0 %v1142_v37 }
 0x34f   : > { %v2363_v38 = vpop.eup %1611 }
 0x350   : > { %v1145_v40 = vsel %vm1009_vm1, %v2363_v38, 0.0 }
 0x351   : > { %1146 = vadd.xlane.f32.xlu1 %v1145_v40 }
 0x353   : > { %v2367_v22 = vpop.eup %1613 }
 0x354   : > { %v1148_v9 = vsel %vm1009_vm1, %v2367_v22, 0.0 }
 0x355   : > { %1149 = vadd.xlane.f32.xlu0 %v1148_v9 }
 0x357   : > { %v2371_v46 = vpop.eup %1615 }
 0x358   : > { %v1151_v14 = vsel %vm1009_vm1, %v2371_v46, 0.0 }
 0x359   : > { %1152 = vadd.xlane.f32.xlu1 %v1151_v14 }
 0x3a6   : > { %v1108_v45 = vpop.xlane.xlu0 %1107 }
 0x3a7   : > { %1617 = vrcp.f32 %v1108_v45 }
 0x3aa   : > { %v1111_v19 = vpop.xlane.xlu1 %1110 }
 0x3ab   : > { %1619 = vrcp.f32 %v1111_v19 }
 0x3ae   : > { %v1114_v43 = vpop.xlane.xlu0 %1113 }
 0x3af   : > { %1621 = vrcp.f32 %v1114_v43 }
 0x3b2   : > { %v1117_v50 = vpop.xlane.xlu1 %1116 }
 0x3b3   : > { %1623 = vrcp.f32 %v1117_v50 }
 0x3b4   : > { %v1618_v44 = vpop.eup %1617 }
 0x3b5   : > { %v1170_v27 = vmul.f32 %v1618_v44, %v2300_v41 }
 0x3b6   : > { %v1120_v52 = vpop.xlane.xlu0 %1119 }
 0x3b7   : > { %1625 = vrcp.f32 %v1120_v52  ;;  %1218 = vrot.lane.b32.xlu0 %v1170_v27, %s1658_s9 }
 0x3b8   : > { %v1620_v53 = vpop.eup %1619 }
 0x3b9   : > { %v1171_v54 = vmul.f32 %v1620_v53, %v2305_v42 }
 0x3ba   : > { %v1123_v34 = vpop.xlane.xlu1 %1122 }
 0x3bb   : > { %1627 = vrcp.f32 %v1123_v34  ;;  %1220 = vrot.lane.b32.xlu1 %v1171_v54, %s1658_s9 }
 0x3bc   : > { %v1622_v57 = vpop.eup %1621 }
 0x3bd   : > { %v1172_v58 = vmul.f32 %v1622_v57, %v2310_v47 }
 0x3be   : > { %v1126_v59 = vpop.xlane.xlu0 %1125 }
 0x3bf   : > { %1629 = vrcp.f32 %v1126_v59  ;;  %1222 = vrot.lane.b32.xlu1 %v1172_v58, %s1658_s9 }
 0x3c0   : > { %v1624_v41 = vpop.eup %1623 }
 0x3c1   : > { %v1173_v39 = vmul.f32 %v1624_v41, %v2315_v55 }
 0x3c2   : > { %v1129_v62 = vpop.xlane.xlu1 %1128 }
 0x3c3   : > { %1631 = vrcp.f32 %v1129_v62  ;;  %1224 = vrot.lane.b32.xlu1 %v1173_v39, %s1658_s9 }
 0x3c4   : > { %v1626_v63 = vpop.eup %1625 }
 0x3c5   : > { %v1174_v42 = vmul.f32 %v1626_v63, %v2320_v60 }
 0x3c6   : > { %v1132_v0 = vpop.xlane.xlu0 %1131 }
 0x3c7   : > { %1633 = vrcp.f32 %v1132_v0  ;;  %1226 = vrot.lane.b32.xlu0 %v1174_v42, %s1658_s9 }
 0x3c8   : > { %v1628_v48 = vpop.eup %1627 }
 0x3c9   : > { %v1175_v47 = vmul.f32 %v1628_v48, %v2325_v1 }
 0x3ca   : > { %v1135_v3 = vpop.xlane.xlu1 %1134 }
 0x3cb   : > { %1635 = vrcp.f32 %v1135_v3  ;;  %1228 = vrot.lane.b32.xlu1 %v1175_v47, %s1658_s9 }
 0x3cc   : > { %v1630_v32 = vpop.eup %1629 }
 0x3cd   : > { %v1176_v55 = vmul.f32 %v1630_v32, %v2330_v33 }
 0x3ce   : > { %v1138_v4 = vpop.xlane.xlu0 %1137 }
 0x3cf   : > { %1637 = vrcp.f32 %v1138_v4  ;;  %1230 = vrot.lane.b32.xlu0 %v1176_v55, %s1658_s9 }
 0x3d0   : > { %v1632_v51 = vpop.eup %1631 }
 0x3d1   : > { %v1177_v60 = vmul.f32 %v1632_v51, %v2335_v11 }
 0x3d2   : > { %v1141_v7 = vpop.xlane.xlu1 %1140 }
 0x3d3   : > { %1639 = vrcp.f32 %v1141_v7  ;;  %1232 = vrot.lane.b32.xlu1 %v1177_v60, %s1658_s9 }
 0x3d4   : > { %v1634_v8 = vpop.eup %1633 }
 0x3d5   : > { %v1178_v1 = vmul.f32 %v1634_v8, %v2340_v17 }
 0x3d6   : > { %v1144_v10 = vpop.xlane.xlu0 %1143 }
 0x3d7   : > { %1641 = vrcp.f32 %v1144_v10  ;;  %1234 = vrot.lane.b32.xlu0 %v1178_v1, %s1658_s9 }
 0x3d8   : > { %v1636_v56 = vpop.eup %1635 }
 0x3d9   : > { %v1179_v33 = vmul.f32 %v1636_v56, %v2345_v23 }
 0x3da   : > { %v1147_v13 = vpop.xlane.xlu1 %1146 }
 0x3db   : > { %1643 = vrcp.f32 %v1147_v13  ;;  %1236 = vrot.lane.b32.xlu1 %v1179_v33, %s1658_s9 }
 0x3dc   : > { %v1638_v15 = vpop.eup %1637 }
 0x3dd   : > { %v1180_v11 = vmul.f32 %v1638_v15, %v2350_v28 }
 0x3de   : > { %v1150_v16 = vpop.xlane.xlu0 %1149 }
 0x3df   : > { %1645 = vrcp.f32 %v1150_v16  ;;  %1238 = vrot.lane.b32.xlu0 %v1180_v11, %s1658_s9 }
 0x3e0   : > { %v1640_v61 = vpop.eup %1639 }
 0x3e1   : > { %v1181_v17 = vmul.f32 %v1640_v61, %v2355_v5 }
 0x3e2   : > { %v1153_v20 = vpop.xlane.xlu1 %1152 }
 0x3e3   : > { %1647 = vrcp.f32 %v1153_v20  ;;  %1240 = vrot.lane.b32.xlu1 %v1181_v17, %s1658_s9 }
 0x3e4   : > { %v1642_v21 = vpop.eup %1641 }
 0x3e5   : > { %v1182_v49 = vmul.f32 %v1642_v21, %v2359_v18 }
 0x3e7   : > { %1242 = vrot.lane.b32.xlu0 %v1182_v49, %s1658_s9 }
 0x3e8   : > { %v1644_v2 = vpop.eup %1643 }
 0x3e9   : > { %v1183_v23 = vmul.f32 %v1644_v2, %v2363_v38 }
 0x3eb   : > { %1244 = vrot.lane.b32.xlu1 %v1183_v23, %s1658_s9 }
 0x3ec   : > { %v1646_v24 = vpop.eup %1645 }
 0x3ed   : > { %v1184_v25 = vmul.f32 %v1646_v24, %v2367_v22 }
 0x3ef   : > { %1246 = vrot.lane.b32.xlu0 %v1184_v25, %s1658_s9 }
 0x3f0   : > { %v1648_v26 = vpop.eup %1647 }
 0x3f1   : > { %v1185_v6 = vmul.f32 %v1648_v26, %v2371_v46 }
 0x3f3   : > { %1248 = vrot.lane.b32.xlu1 %v1185_v6, %s1658_s9 }
 0x429   : > { %v1219_v28 = vpop.permute.xlu0 %1218 }
 0x42a   : > { %1267 = vst.msk [vmem:[%s2165_s18] sm:$0xff] %vm1266_vm2, %v1219_v28 }
 0x42d   : > { %v1221_v29 = vpop.permute.xlu1 %1220 }
 0x42e   : > { %1268 = vst.msk [vmem:[%s2165_s18 + $0x8] sm:$0xff] %vm1266_vm2, %v1221_v29 }
 0x431   : > { %v1223_v30 = vpop.permute.xlu1 %1222 }
 0x432   : > { %1269 = vst.msk [vmem:[%s2165_s18 + $0x10] sm:$0xff] %vm1266_vm2, %v1223_v30 }
 0x435   : > { %v1225_v31 = vpop.permute.xlu1 %1224 }
 0x436   : > { %1270 = vst.msk [vmem:[%s2165_s18 + $0x18] sm:$0xff] %vm1266_vm2, %v1225_v31 }
 0x439   : > { %v1227_v12 = vpop.permute.xlu0 %1226 }
 0x43a   : > { %1271 = vst.msk [vmem:[%s2165_s18 + $0x20] sm:$0xff] %vm1266_vm2, %v1227_v12 }
 0x43d   : > { %v1229_v5 = vpop.permute.xlu1 %1228 }
 0x43e   : > { %1272 = vst.msk [vmem:[%s2165_s18 + $0x28] sm:$0xff] %vm1266_vm2, %v1229_v5 }
 0x441   : > { %v1231_v35 = vpop.permute.xlu0 %1230 }
 0x442   : > { %1273 = vst.msk [vmem:[%s2165_s18 + $0x30] sm:$0xff] %vm1266_vm2, %v1231_v35 }
 0x445   : > { %v1233_v36 = vpop.permute.xlu1 %1232 }
 0x446   : > { %1274 = vst.msk [vmem:[%s2165_s18 + $0x38] sm:$0xff] %vm1266_vm2, %v1233_v36 }
 0x449   : > { %v1235_v18 = vpop.permute.xlu0 %1234 }
 0x44a   : > { %1275 = vst.msk [vmem:[%s2165_s18 + $0x40] sm:$0xff] %vm1266_vm2, %v1235_v18 }
 0x44d   : > { %v1237_v37 = vpop.permute.xlu1 %1236 }
 0x44e   : > { %1276 = vst.msk [vmem:[%s2165_s18 + $0x48] sm:$0xff] %vm1266_vm2, %v1237_v37 }
 0x451   : > { %v1239_v38 = vpop.permute.xlu0 %1238 }
 0x452   : > { %1277 = vst.msk [vmem:[%s2165_s18 + $0x50] sm:$0xff] %vm1266_vm2, %v1239_v38 }
 0x455   : > { %v1241_v40 = vpop.permute.xlu1 %1240 }
 0x456   : > { %1278 = vst.msk [vmem:[%s2165_s18 + $0x58] sm:$0xff] %vm1266_vm2, %v1241_v40 }
 0x459   : > { %v1243_v22 = vpop.permute.xlu0 %1242 }
 0x45a   : > { %1279 = vst.msk [vmem:[%s2165_s18 + $0x60] sm:$0xff] %vm1266_vm2, %v1243_v22 }
 0x45d   : > { %v1245_v9 = vpop.permute.xlu1 %1244 }
 0x45e   : > { %1280 = vst.msk [vmem:[%s2165_s18 + $0x68] sm:$0xff] %vm1266_vm2, %v1245_v9 }
 0x461   : > { %v1247_v46 = vpop.permute.xlu0 %1246 }
 0x462   : > { %1281 = vst.msk [vmem:[%s2165_s18 + $0x70] sm:$0xff] %vm1266_vm2, %v1247_v46 }
 0x465   : > { %v1249_v14 = vpop.permute.xlu1 %1248 }
 0x466   : > { %1282 = vst.msk [vmem:[%s2165_s18 + $0x78] sm:$0xff] %vm1266_vm2, %v1249_v14 }
 0x467 PF: > { %s17_s24 = sadd.s32 1, %s1655_s24  }
 0x468   : > { %p14_p4 = scmp.ge.s32.totalorder %s17_s24, 4  }
 0x46a   :  { %16 = sbr.rel (!%p14_p4) target bundleno = 1 (0x1), region = 78 }

</bundles_post_ra>
